<compile_context>
chip_gen: v6e
topology: v6e:2x2x1
jax: 0.10.0
libtpu: 0.0.40
codegen_flags: <defaults>
</compile_context>

<pallas_src>
import functools

import jax
import jax.numpy as jnp
from jax import lax
from jax.experimental import pallas as pl
from jax.experimental.pallas import tpu as pltpu


def _cdiv(a, b):
    return (a + b - 1) // b


def _round_up(x, m):
    return ((x + m - 1) // m) * m


def _ceil_div(a, b):
    # Python ceil division (b > 0, a may be negative).
    return -((-a) // b)


# ---------------------------------------------------------------------------
# Trace-time helpers for the "phase + lane-shift" sliding-window scheme.
# Conceptual extended phase dd of a tile == phase (dd % nphase) read at lane
# k + dd // nphase, i.e. lane-shift level q = dd // nphase (halo from the next
# time tile supplies the last q lanes).
# ---------------------------------------------------------------------------
def _shift_levels(dd_starts, ktaps, nphase):
    """Lane-shift levels (q >= 1) needed and the phase range used per level."""
    levels = {}
    for dd0 in dd_starts:
        for j in range(ktaps):
            q, p = divmod(dd0 + j, nphase)
            if q == 0:
                continue
            lo, hi = levels.get(q, (p, p))
            levels[q] = (min(lo, p), max(hi, p))
    return levels


def _build_views(cur_ref, nxt_ref, chan, levels):
    """views[q] = (row source for lane-shift q, first phase held by it).

    Level 0 is the (un-shifted) current-tile ref itself.  For q >= 1 a single
    lane-shifted copy of only the needed phase rows is materialized once per
    grid step (instead of one concatenate per (phase, tap))."""
    T = cur_ref.shape[-1]
    views = {0: (cur_ref, 0)}
    for q in sorted(levels):
        p_lo, p_hi = levels[q]
        a, b = p_lo * chan, (p_hi + 1) * chan
        shifted = jnp.concatenate(
            [cur_ref[a:b, q:T], nxt_ref[a:b, 0:q]], axis=-1)
        views[q] = (shifted, p_lo)
    return views


def _window_matmul(w_ref, views, dd0, ktaps, nphase, chan):
    """sum_j  W[:, j*chan:(j+1)*chan] @ phase(dd0 + j).

    Consecutive taps living in the same lane-shift level are grouped into one
    MXU matmul with contraction depth g*chan (K folded into the contraction)."""
    acc = None
    j = 0
    while j < ktaps:
        q, p = divmod(dd0 + j, nphase)
        g = min(ktaps - j, nphase - p)          # taps handled by this group
        src, p_base = views[q]
        rows = src[(p - p_base) * chan:(p - p_base + g) * chan, :]   # (g*chan, T)
        wjs = w_ref[:, j * chan:(j + g) * chan]                      # (Cout, g*chan)
        part = jnp.dot(wjs, rows, preferred_element_type=jnp.float32)
        acc = part if acc is None else acc + part
        j += g
    return acc


# ---------------------------------------------------------------------------
# Kernel A: conv1 (stride s) + folded BN1 + ReLU -> pool-phase layout (bf16)
# ---------------------------------------------------------------------------
def _conv1_bn_relu_kernel(x_cur, x_nxt, w_ref, sh_ref, o_ref, *,
                          P, K, stride, A, L1):
    # x_cur/x_nxt : (S*Cin, T) bf16 -- current / next time tile of the
    #               phase-decomposed padded input, rows = phase*Cin + c:
    #               x_cur[d*Cin + c, k] = x_pad[c, (m*T + k)*S + d],  S = P*stride
    # w_ref       : (Cout, K*Cin) bf16 -- conv1 weight (BN1 scale folded),
    #               column = tap*Cin + c
    # sh_ref      : (Cout, 1) f32 -- BN1 shift
    # o_ref       : (P, Cout, T) bf16 -- pool-phase layout of relu(bn1(conv1)):
    #               o_ref[p, :, k] = y1[:, (m*T + k - A)*P + p]  (0 outside [0,L1))
    _, Cout, T = o_ref.shape
    Cin = w_ref.shape[1] // K
    S = P * stride
    m0 = pl.program_id(1) * T
    shift = sh_ref[...]
    lane = lax.broadcasted_iota(jnp.int32, (1, T), 1)

    levels = _shift_levels([p * stride for p in range(P)], K, S)
    views = _build_views(x_cur, x_nxt, Cin, levels)

    k_lo = A - m0                                 # first lane with t1 >= 0
    for p in range(P):
        acc = _window_matmul(w_ref, views, p * stride, K, S, Cin)
        y = jnp.maximum(acc + shift, 0.0)         # folded BN1 + ReLU (f32)
        # zero-fill positions outside [0, L1): conv2's / pool's zero padding
        # relies on these lanes being exactly 0.
        k_hi = (L1 - 1 - p) // P + A + 1 - m0
        y = jnp.where((lane >= k_lo) & (lane < k_hi), y, 0.0)
        o_ref[p] = y.astype(o_ref.dtype)


# ---------------------------------------------------------------------------
# Kernel B: conv2 (stride 1) + folded BN2 + ReLU + MaxPool1d, fully fused
# ---------------------------------------------------------------------------
def _conv2_bn_relu_pool_kernel(y_cur, y_nxt, w_ref, sh_ref, o_ref, *,
                               P, K, r, padP, L2):
    # y_cur/y_nxt : (P*Cout, T) bf16 -- current / next time tile of y1 in
    #               pool-phase layout, rows = phase*Cout + c
    # w_ref       : (Cout, K*Cout) bf16 -- conv2 weight (BN2 scale folded)
    # sh_ref      : (Cout, 1) f32 -- BN2 shift
    # o_ref       : (Cout, T) f32 -- max-pooled output tile (pooled pos u0..u0+T)
    Cout, T = o_ref.shape
    u0 = pl.program_id(1) * T
    shift = sh_ref[...]
    lane = lax.broadcasted_iota(jnp.int32, (1, T), 1)

    levels = _shift_levels([i + r for i in range(P)], K, P)
    views = _build_views(y_cur, y_nxt, Cout, levels)

    best = None
    for i in range(P):                            # position inside pool window
        acc = _window_matmul(w_ref, views, i + r, K, P, Cout)
        z = jnp.maximum(acc + shift, 0.0)         # folded BN2 + ReLU (f32)
        # conv2 position for this slot: t2 = (u0+k)*P - padP + i.  Out-of-range
        # positions are masked to 0 -- valid ONLY because post-ReLU values are
        # >= 0, so 0 never wins the max over the pool window.
        k_lo = _ceil_div(padP - i, P) - u0
        k_hi = (L2 - 1 + padP - i) // P + 1 - u0
        z = jnp.where((lane >= k_lo) & (lane < k_hi), z, 0.0)
        best = z if best is None else jnp.maximum(best, z)
    o_ref[...] = best.astype(o_ref.dtype)


# ---------------------------------------------------------------------------
# Host wrapper: phase decomposition, BN folding, halo BlockSpecs, tiling
# ---------------------------------------------------------------------------
@functools.partial(jax.jit, static_argnames=("stride", "pool_size", "lane_tile"))
def leenet_conv_block2_forward(x, w1, scale1, shift1, w2, scale2, shift2,
                               *, stride, pool_size, lane_tile=1024):
    N, Cin, L = x.shape
    Cout, _, K = w1.shape
    s = int(stride)
    P = int(pool_size) if (pool_size and pool_size > 1) else 1
    pad1 = K // 2
    pad2 = K // 2
    padP = P // 2 if P > 1 else 0
    S = P * s

    L1 = (L + 2 * pad1 - K) // s + 1                       # conv1 output length
    L2 = (L1 + 2 * pad2 - K) + 1                           # conv2 output length
    Lp = (L2 + 2 * padP - P) // P + 1 if P > 1 else L2     # pooled output length

    A = _ceil_div(padP + pad2, P)          # lane shift so halo offsets stay >= 0
    r = A * P - (padP + pad2)

    # lane-dense time tile (multiple of 128), shared by both kernels
    T = min(int(lane_tile), _round_up(max(Lp, 1), 128))
    n_u = _cdiv(Lp, T)                     # kernel-B (pooled) time tiles
    n_m = n_u + 1                          # kernel-A (y1) time tiles (+1 halo)
    n_x = max(n_m + 1, _cdiv(A * S + pad1 + L, T * S))     # x tiles (+1 halo)

    assert (P - 1) * s + (K - 1) < T * S, "lane tile too small for kernel size"
    assert (P - 1) + r + (K - 1) < T * P, "lane tile too small for pool size"

    # ---- phase-decomposed, zero-padded, tile-blocked input (bf16, no K-fold
    # duplication; rows = phase*Cin + c so sublanes are densely packed) ----
    left = A * S + pad1
    total = n_x * T * S
    xb = jnp.pad(x.astype(jnp.bfloat16),
                 ((0, 0), (0, 0), (left, total - left - L)))
    x_tiled = (xb.reshape(N, Cin, n_x, T, S)
                 .transpose(0, 2, 4, 1, 3)                 # (N, n_x, S, Cin, T)
                 .reshape(N, n_x, S * Cin, T))

    # ---- fold BN scale into conv weights; taps along the contraction dim ----
    w1f = (w1 * scale1[:, None, None]).transpose(0, 2, 1).reshape(Cout, K * Cin)
    w2f = (w2 * scale2[:, None, None]).transpose(0, 2, 1).reshape(Cout, K * Cout)
    w1f = w1f.astype(jnp.bfloat16)
    w2f = w2f.astype(jnp.bfloat16)
    sh1 = shift1.reshape(Cout, 1).astype(jnp.float32)
    sh2 = shift2.reshape(Cout, 1).astype(jnp.float32)

    cparams = pltpu.CompilerParams(
        dimension_semantics=("parallel", "parallel"),
        vmem_limit_bytes=32 * 1024 * 1024)

    # ---- kernel A: conv1 + BN1 + ReLU -> pool-phase layout (bf16) ----
    y1 = pl.pallas_call(
        functools.partial(_conv1_bn_relu_kernel,
                          P=P, K=K, stride=s, A=A, L1=L1),
        out_shape=jax.ShapeDtypeStruct((N, n_m, P, Cout, T), jnp.bfloat16),
        grid=(N, n_m),
        in_specs=[
            pl.BlockSpec((None, None, S * Cin, T), lambda n, m: (n, m, 0, 0)),
            pl.BlockSpec((None, None, S * Cin, T), lambda n, m: (n, m + 1, 0, 0)),
            pl.BlockSpec((Cout, K * Cin), lambda n, m: (0, 0)),
            pl.BlockSpec((Cout, 1), lambda n, m: (0, 0)),
        ],
        out_specs=pl.BlockSpec((None, None, P, Cout, T),
                               lambda n, m: (n, m, 0, 0, 0)),
        compiler_params=cparams,
    )(x_tiled, x_tiled, w1f, sh1)

    # free (adjacent-dims) reshape: kernel B sees y1 with phase*Cout merged rows
    y1m = y1.reshape(N, n_m, P * Cout, T)

    # ---- kernel B: conv2 + BN2 + ReLU + MaxPool1d, fused ----
    out_pad = pl.pallas_call(
        functools.partial(_conv2_bn_relu_pool_kernel,
                          P=P, K=K, r=r, padP=padP, L2=L2),
        out_shape=jax.ShapeDtypeStruct((N, Cout, n_u * T), jnp.float32),
        grid=(N, n_u),
        in_specs=[
            pl.BlockSpec((None, None, P * Cout, T), lambda n, u: (n, u, 0, 0)),
            pl.BlockSpec((None, None, P * Cout, T), lambda n, u: (n, u + 1, 0, 0)),
            pl.BlockSpec((Cout, K * Cout), lambda n, u: (0, 0)),
            pl.BlockSpec((Cout, 1), lambda n, u: (0, 0)),
        ],
        out_specs=pl.BlockSpec((None, Cout, T), lambda n, u: (n, 0, u)),
        compiler_params=cparams,
    )(y1m, y1m, w2f, sh2)

    return out_pad[:, :, :Lp]


# ---------------------------------------------------------------------------
# Module
# ---------------------------------------------------------------------------
class LeeNetConvBlock2:
    """Pallas port of the PyTorch LeeNetConvBlock2 (BatchNorm in inference mode)."""

    def __init__(self, in_channels, out_channels, kernel_size, stride,
                 pool_size=1, *, key):
        self.stride = stride
        self.pool_size = pool_size
        self.eps = 1e-5
        ks = jax.random.split(key, 10)
        # conv weights (no bias, like the PyTorch module)
        self.w1 = 0.1 * jax.random.normal(
            ks[0], (out_channels, in_channels, kernel_size), jnp.float32)
        self.w2 = 0.1 * jax.random.normal(
            ks[1], (out_channels, out_channels, kernel_size), jnp.float32)
        # BN1 / BN2 parameters + running stats (deterministic, synthetic)
        self.g1 = 1.0 + 0.1 * jax.random.normal(ks[2], (out_channels,), jnp.float32)
        self.b1 = 0.1 * jax.random.normal(ks[3], (out_channels,), jnp.float32)
        self.m1 = 0.1 * jax.random.normal(ks[4], (out_channels,), jnp.float32)
        self.v1 = jax.nn.softplus(jax.random.normal(ks[5], (out_channels,), jnp.float32)) + 0.5
        self.g2 = 1.0 + 0.1 * jax.random.normal(ks[6], (out_channels,), jnp.float32)
        self.b2 = 0.1 * jax.random.normal(ks[7], (out_channels,), jnp.float32)
        self.m2 = 0.1 * jax.random.normal(ks[8], (out_channels,), jnp.float32)
        self.v2 = jax.nn.softplus(jax.random.normal(ks[9], (out_channels,), jnp.float32)) + 0.5

    def _fold_bn(self, gamma, beta, mean, var):
        scale = gamma / jnp.sqrt(var + self.eps)
        shift = beta - mean * scale
        return scale, shift

    def __call__(self, x):
        # TODO(synk): training-mode BatchNorm (batch statistics) not implemented;
        # BN is applied in inference mode via folded per-channel scale/shift.
        s1, sh1 = self._fold_bn(self.g1, self.b1, self.m1, self.v1)
        s2, sh2 = self._fold_bn(self.g2, self.b2, self.m2, self.v2)
        return leenet_conv_block2_forward(
            x, self.w1, s1, sh1, self.w2, s2, sh2,
            stride=self.stride, pool_size=self.pool_size)


# ---------------------------------------------------------------------------
# Pure-JAX reference (for correctness check)
# ---------------------------------------------------------------------------
def reference_forward(block, x):
    def conv(x, w, stride):
        pad = w.shape[2] // 2
        return lax.conv_general_dilated(
            x, w, window_strides=(stride,), padding=[(pad, pad)],
            dimension_numbers=("NCH", "OIH", "NCH"))

    def bn(x, g, b, m, v):
        return (x - m[None, :, None]) / jnp.sqrt(v[None, :, None] + block.eps) \
               * g[None, :, None] + b[None, :, None]

    y = jax.nn.relu(bn(conv(x, block.w1, block.stride),
                       block.g1, block.b1, block.m1, block.v1))
    y = jax.nn.relu(bn(conv(y, block.w2, 1),
                       block.g2, block.b2, block.m2, block.v2))
    if block.pool_size != 1:
        p = block.pool_size
        pad = p // 2
        y = lax.reduce_window(
            y, -jnp.inf, lax.max,
            window_dimensions=(1, 1, p), window_strides=(1, 1, p),
            padding=((0, 0), (0, 0), (pad, pad)))
    return y


if __name__ == "__main__":
    key = jax.random.PRNGKey(0)
    k1, k2, k3, kx = jax.random.split(key, 4)

    # Small shapes consistent with a Conv1d block: (batch, in_channels, length)
    N, Cin, L = 2, 4, 16
    Cout, K = 8, 3
    x = jax.random.normal(kx, (N, Cin, L), jnp.float32)

    cases = [
        ("stride2_pool3", LeeNetConvBlock2(Cin, Cout, K, stride=2, pool_size=3, key=k1)),
        ("stride1_pool3", LeeNetConvBlock2(Cin, Cout, K, stride=1, pool_size=3, key=k2)),
        ("stride1_pool1", LeeNetConvBlock2(Cin, Cout, K, stride=1, pool_size=1, key=k3)),
    ]
    for name, blk in cases:
        out = jax.block_until_ready(blk(x))
        ref = jax.block_until_ready(reference_forward(blk, x))
        assert out.shape == ref.shape, (name, out.shape, ref.shape)
        err = float(jnp.max(jnp.abs(out - ref)))
        assert jnp.allclose(out, ref, atol=2e-2, rtol=2e-2), (name, err)

    print("KERNEL_OK")
</pallas_src>

<mosaic_0001>
module attributes {stable_mosaic.version = 11 : i64} {
  func.func @_conv2_bn_relu_pool_kernel(%arg0: i32, %arg1: i32, %arg2: memref<1x1x24x128xbf16, #tpu.memory_space<vmem>>, %arg3: memref<1x1x24x128xbf16, #tpu.memory_space<vmem>>, %arg4: memref<8x24xbf16, #tpu.memory_space<vmem>>, %arg5: memref<8x1xf32, #tpu.memory_space<vmem>>, %arg6: memref<1x8x128xf32, #tpu.memory_space<vmem>>) attributes {dimension_semantics = [#tpu.dimension_semantics<parallel>, #tpu.dimension_semantics<parallel>], iteration_bounds = array<i64: 2, 1>, scalar_prefetch = 0 : i64, scratch_operands = 0 : i64, tpu.core_type = #tpu.core_type<tc>, window_params = [{transform_indices = @transform_0, window_bounds = array<i64: 1, 1, 24, 128>}, {transform_indices = @transform_1, window_bounds = array<i64: 1, 1, 24, 128>}, {pipeline_mode = #tpu.pipeline_mode<synchronous>, transform_indices = @transform_2, window_bounds = array<i64: 8, 24>}, {pipeline_mode = #tpu.pipeline_mode<synchronous>, transform_indices = @transform_3, window_bounds = array<i64: 8, 1>}, {transform_indices = @transform_4, window_bounds = array<i64: 1, 8, 128>}]} {
    %c128_i32 = arith.constant 128 : i32
    %0 = arith.muli %arg1, %c128_i32 : i32
    %c0 = arith.constant 0 : index
    %c0_0 = arith.constant 0 : index
    %1 = vector.load %arg5[%c0, %c0_0] : memref<8x1xf32, #tpu.memory_space<vmem>>, vector<8x1xf32>
    %2 = tpu.iota {dimensions = array<i32: 1>} : vector<1x128xi32>
    %c0_1 = arith.constant 0 : index
    %c0_2 = arith.constant 0 : index
    %c0_3 = arith.constant 0 : index
    %c1 = arith.constant 1 : index
    %3 = vector.load %arg2[%c0_1, %c0_2, %c0_3, %c1] : memref<1x1x24x128xbf16, #tpu.memory_space<vmem>>, vector<1x1x24x127xbf16>
    %4 = vector.shape_cast %3 : vector<1x1x24x127xbf16> to vector<24x127xbf16>
    %c0_4 = arith.constant 0 : index
    %c0_5 = arith.constant 0 : index
    %c0_6 = arith.constant 0 : index
    %c0_7 = arith.constant 0 : index
    %5 = vector.load %arg3[%c0_4, %c0_5, %c0_6, %c0_7] : memref<1x1x24x128xbf16, #tpu.memory_space<vmem>>, vector<1x1x24x1xbf16>
    %6 = vector.shape_cast %5 : vector<1x1x24x1xbf16> to vector<24x1xbf16>
    %7 = tpu.concatenate %4, %6 in 1 : vector<24x127xbf16>, vector<24x1xbf16> -> vector<24x128xbf16>
    %c0_8 = arith.constant 0 : index
    %c0_9 = arith.constant 0 : index
    %c8 = arith.constant 8 : index
    %c0_10 = arith.constant 0 : index
    %8 = vector.load %arg2[%c0_8, %c0_9, %c8, %c0_10] : memref<1x1x24x128xbf16, #tpu.memory_space<vmem>>, vector<1x1x16x128xbf16>
    %9 = vector.shape_cast %8 : vector<1x1x16x128xbf16> to vector<16x128xbf16>
    %c0_11 = arith.constant 0 : index
    %c0_12 = arith.constant 0 : index
    %10 = vector.load %arg4[%c0_11, %c0_12] : memref<8x24xbf16, #tpu.memory_space<vmem>>, vector<8x16xbf16>
    %cst = arith.constant dense<0.000000e+00> : vector<8x128xf32>
    %11 = tpu.matmul %10, %9, %cst {dimension_numbers = #tpu.dot_dimension_numbers<[1], [0], [0], [1], [0, 0, 1, 1], [], []>} : vector<8x16xbf16>, vector<16x128xbf16>, vector<8x128xf32> -> vector<8x128xf32>
    %12 = vector.extract_strided_slice %7 {offsets = [0, 0], sizes = [8, 128], strides = [1, 1]} : vector<24x128xbf16> to vector<8x128xbf16>
    %c0_13 = arith.constant 0 : index
    %c16 = arith.constant 16 : index
    %13 = vector.load %arg4[%c0_13, %c16] : memref<8x24xbf16, #tpu.memory_space<vmem>>, vector<8x8xbf16>
    %cst_14 = arith.constant dense<0.000000e+00> : vector<8x128xf32>
    %14 = tpu.matmul %13, %12, %cst_14 {dimension_numbers = #tpu.dot_dimension_numbers<[1], [0], [0], [1], [0, 0, 1, 1], [], []>} : vector<8x8xbf16>, vector<8x128xbf16>, vector<8x128xf32> -> vector<8x128xf32>
    %15 = arith.addf %11, %14 : vector<8x128xf32>
    %16 = vector.broadcast %1 : vector<8x1xf32> to vector<8x128xf32>
    %17 = arith.addf %15, %16 : vector<8x128xf32>
    %cst_15 = arith.constant 0.000000e+00 : f32
    %18 = vector.broadcast %cst_15 : f32 to vector<8x128xf32>
    %19 = arith.maximumf %17, %18 : vector<8x128xf32>
    %c1_i32 = arith.constant 1 : i32
    %20 = arith.subi %c1_i32, %0 : i32
    %c3_i32 = arith.constant 3 : i32
    %21 = arith.subi %c3_i32, %0 : i32
    %22 = vector.broadcast %20 : i32 to vector<1x128xi32>
    %23 = arith.cmpi sge, %2, %22 : vector<1x128xi32>
    %24 = vector.broadcast %21 : i32 to vector<1x128xi32>
    %25 = arith.cmpi slt, %2, %24 : vector<1x128xi32>
    %26 = arith.andi %23, %25 : vector<1x128xi1>
    %cst_16 = arith.constant 0.000000e+00 : f32
    %27 = vector.shape_cast %26 : vector<1x128xi1> to vector<1x128xi1>
    %28 = vector.broadcast %27 : vector<1x128xi1> to vector<8x128xi1>
    %29 = vector.broadcast %cst_16 : f32 to vector<8x128xf32>
    %30 = arith.select %28, %19, %29 : vector<8x128xi1>, vector<8x128xf32>
    %c0_17 = arith.constant 0 : index
    %c0_18 = arith.constant 0 : index
    %c16_19 = arith.constant 16 : index
    %c0_20 = arith.constant 0 : index
    %31 = vector.load %arg2[%c0_17, %c0_18, %c16_19, %c0_20] : memref<1x1x24x128xbf16, #tpu.memory_space<vmem>>, vector<1x1x8x128xbf16>
    %32 = vector.shape_cast %31 : vector<1x1x8x128xbf16> to vector<8x128xbf16>
    %c0_21 = arith.constant 0 : index
    %c0_22 = arith.constant 0 : index
    %33 = vector.load %arg4[%c0_21, %c0_22] : memref<8x24xbf16, #tpu.memory_space<vmem>>, vector<8x8xbf16>
    %cst_23 = arith.constant dense<0.000000e+00> : vector<8x128xf32>
    %34 = tpu.matmul %33, %32, %cst_23 {dimension_numbers = #tpu.dot_dimension_numbers<[1], [0], [0], [1], [0, 0, 1, 1], [], []>} : vector<8x8xbf16>, vector<8x128xbf16>, vector<8x128xf32> -> vector<8x128xf32>
    %35 = vector.extract_strided_slice %7 {offsets = [0, 0], sizes = [16, 128], strides = [1, 1]} : vector<24x128xbf16> to vector<16x128xbf16>
    %c0_24 = arith.constant 0 : index
    %c8_25 = arith.constant 8 : index
    %36 = vector.load %arg4[%c0_24, %c8_25] : memref<8x24xbf16, #tpu.memory_space<vmem>>, vector<8x16xbf16>
    %cst_26 = arith.constant dense<0.000000e+00> : vector<8x128xf32>
    %37 = tpu.matmul %36, %35, %cst_26 {dimension_numbers = #tpu.dot_dimension_numbers<[1], [0], [0], [1], [0, 0, 1, 1], [], []>} : vector<8x16xbf16>, vector<16x128xbf16>, vector<8x128xf32> -> vector<8x128xf32>
    %38 = arith.addf %34, %37 : vector<8x128xf32>
    %39 = vector.broadcast %1 : vector<8x1xf32> to vector<8x128xf32>
    %40 = arith.addf %38, %39 : vector<8x128xf32>
    %cst_27 = arith.constant 0.000000e+00 : f32
    %41 = vector.broadcast %cst_27 : f32 to vector<8x128xf32>
    %42 = arith.maximumf %40, %41 : vector<8x128xf32>
    %c0_i32 = arith.constant 0 : i32
    %43 = arith.subi %c0_i32, %0 : i32
    %c3_i32_28 = arith.constant 3 : i32
    %44 = arith.subi %c3_i32_28, %0 : i32
    %45 = vector.broadcast %43 : i32 to vector<1x128xi32>
    %46 = arith.cmpi sge, %2, %45 : vector<1x128xi32>
    %47 = vector.broadcast %44 : i32 to vector<1x128xi32>
    %48 = arith.cmpi slt, %2, %47 : vector<1x128xi32>
    %49 = arith.andi %46, %48 : vector<1x128xi1>
    %cst_29 = arith.constant 0.000000e+00 : f32
    %50 = vector.shape_cast %49 : vector<1x128xi1> to vector<1x128xi1>
    %51 = vector.broadcast %50 : vector<1x128xi1> to vector<8x128xi1>
    %52 = vector.broadcast %cst_29 : f32 to vector<8x128xf32>
    %53 = arith.select %51, %42, %52 : vector<8x128xi1>, vector<8x128xf32>
    %54 = arith.maximumf %30, %53 : vector<8x128xf32>
    %c0_30 = arith.constant 0 : index
    %c0_31 = arith.constant 0 : index
    %55 = vector.load %arg4[%c0_30, %c0_31] : memref<8x24xbf16, #tpu.memory_space<vmem>>, vector<8x24xbf16>
    %cst_32 = arith.constant dense<0.000000e+00> : vector<8x128xf32>
    %56 = tpu.matmul %55, %7, %cst_32 {dimension_numbers = #tpu.dot_dimension_numbers<[1], [0], [0], [1], [0, 0, 1, 1], [], []>} : vector<8x24xbf16>, vector<24x128xbf16>, vector<8x128xf32> -> vector<8x128xf32>
    %57 = vector.broadcast %1 : vector<8x1xf32> to vector<8x128xf32>
    %58 = arith.addf %56, %57 : vector<8x128xf32>
    %cst_33 = arith.constant 0.000000e+00 : f32
    %59 = vector.broadcast %cst_33 : f32 to vector<8x128xf32>
    %60 = arith.maximumf %58, %59 : vector<8x128xf32>
    %c0_i32_34 = arith.constant 0 : i32
    %61 = arith.subi %c0_i32_34, %0 : i32
    %c3_i32_35 = arith.constant 3 : i32
    %62 = arith.subi %c3_i32_35, %0 : i32
    %63 = vector.broadcast %61 : i32 to vector<1x128xi32>
    %64 = arith.cmpi sge, %2, %63 : vector<1x128xi32>
    %65 = vector.broadcast %62 : i32 to vector<1x128xi32>
    %66 = arith.cmpi slt, %2, %65 : vector<1x128xi32>
    %67 = arith.andi %64, %66 : vector<1x128xi1>
    %cst_36 = arith.constant 0.000000e+00 : f32
    %68 = vector.shape_cast %67 : vector<1x128xi1> to vector<1x128xi1>
    %69 = vector.broadcast %68 : vector<1x128xi1> to vector<8x128xi1>
    %70 = vector.broadcast %cst_36 : f32 to vector<8x128xf32>
    %71 = arith.select %69, %60, %70 : vector<8x128xi1>, vector<8x128xf32>
    %72 = arith.maximumf %54, %71 : vector<8x128xf32>
    %c0_37 = arith.constant 0 : index
    %c0_38 = arith.constant 0 : index
    %c0_39 = arith.constant 0 : index
    %73 = vector.load %arg6[%c0_37, %c0_38, %c0_39] : memref<1x8x128xf32, #tpu.memory_space<vmem>>, vector<1x8x128xf32>
    %74 = vector.shape_cast %73 : vector<1x8x128xf32> to vector<8x128xf32>
    %75 = vector.shape_cast %72 : vector<8x128xf32> to vector<1x8x128xf32>
    tpu.vector_store %arg6[%c0_37, %c0_38, %c0_39], %75 {strides = array<i32>} : memref<1x8x128xf32, #tpu.memory_space<vmem>>, vector<1x8x128xf32>,
    return
  }
  func.func @transform_0(%arg0: i32, %arg1: i32) -> (i32, i32, i32, i32) {
    %c0_i32 = arith.constant 0 : i32
    %c0_i32_0 = arith.constant 0 : i32
    %c0_i32_1 = arith.constant 0 : i32
    return %arg0, %arg1, %c0_i32, %c0_i32_0 : i32, i32, i32, i32
  }
  func.func @transform_1(%arg0: i32, %arg1: i32) -> (i32, i32, i32, i32) {
    %c1_i32 = arith.constant 1 : i32
    %0 = arith.addi %arg1, %c1_i32 : i32
    %c0_i32 = arith.constant 0 : i32
    %c0_i32_0 = arith.constant 0 : i32
    %c0_i32_1 = arith.constant 0 : i32
    return %arg0, %0, %c0_i32, %c0_i32_0 : i32, i32, i32, i32
  }
  func.func @transform_2(%arg0: i32, %arg1: i32) -> (i32, i32) {
    %c0_i32 = arith.constant 0 : i32
    %c0_i32_0 = arith.constant 0 : i32
    %c0_i32_1 = arith.constant 0 : i32
    return %c0_i32, %c0_i32_0 : i32, i32
  }
  func.func @transform_3(%arg0: i32, %arg1: i32) -> (i32, i32) {
    %c0_i32 = arith.constant 0 : i32
    %c0_i32_0 = arith.constant 0 : i32
    %c0_i32_1 = arith.constant 0 : i32
    return %c0_i32, %c0_i32_0 : i32, i32
  }
  func.func @transform_4(%arg0: i32, %arg1: i32) -> (i32, i32, i32) {
    %c0_i32 = arith.constant 0 : i32
    %c0_i32_0 = arith.constant 0 : i32
    return %arg0, %c0_i32, %arg1 : i32, i32, i32
  }
}

module attributes {stable_mosaic.version = 11 : i64} {
  func.func @_conv1_bn_relu_kernel(%arg0: i32, %arg1: i32, %arg2: memref<1x1x24x128xbf16, #tpu.memory_space<vmem>>, %arg3: memref<1x1x24x128xbf16, #tpu.memory_space<vmem>>, %arg4: memref<8x12xbf16, #tpu.memory_space<vmem>>, %arg5: memref<8x1xf32, #tpu.memory_space<vmem>>, %arg6: memref<1x1x3x8x128xbf16, #tpu.memory_space<vmem>>) attributes {dimension_semantics = [#tpu.dimension_semantics<parallel>, #tpu.dimension_semantics<parallel>], iteration_bounds = array<i64: 2, 2>, scalar_prefetch = 0 : i64, scratch_operands = 0 : i64, tpu.core_type = #tpu.core_type<tc>, window_params = [{transform_indices = @transform_0, window_bounds = array<i64: 1, 1, 24, 128>}, {transform_indices = @transform_1, window_bounds = array<i64: 1, 1, 24, 128>}, {pipeline_mode = #tpu.pipeline_mode<synchronous>, transform_indices = @transform_2, window_bounds = array<i64: 8, 12>}, {pipeline_mode = #tpu.pipeline_mode<synchronous>, transform_indices = @transform_3, window_bounds = array<i64: 8, 1>}, {transform_indices = @transform_4, window_bounds = array<i64: 1, 1, 3, 8, 128>}]} {
    %c128_i32 = arith.constant 128 : i32
    %0 = arith.muli %arg1, %c128_i32 : i32
    %c0 = arith.constant 0 : index
    %c0_0 = arith.constant 0 : index
    %1 = vector.load %arg5[%c0, %c0_0] : memref<8x1xf32, #tpu.memory_space<vmem>>, vector<8x1xf32>
    %2 = tpu.iota {dimensions = array<i32: 1>} : vector<1x128xi32>
    %c0_1 = arith.constant 0 : index
    %c0_2 = arith.constant 0 : index
    %c0_3 = arith.constant 0 : index
    %c1 = arith.constant 1 : index
    %3 = vector.load %arg2[%c0_1, %c0_2, %c0_3, %c1] : memref<1x1x24x128xbf16, #tpu.memory_space<vmem>>, vector<1x1x4x127xbf16>
    %4 = vector.shape_cast %3 : vector<1x1x4x127xbf16> to vector<4x127xbf16>
    %c0_4 = arith.constant 0 : index
    %c0_5 = arith.constant 0 : index
    %c0_6 = arith.constant 0 : index
    %c0_7 = arith.constant 0 : index
    %5 = vector.load %arg3[%c0_4, %c0_5, %c0_6, %c0_7] : memref<1x1x24x128xbf16, #tpu.memory_space<vmem>>, vector<1x1x4x1xbf16>
    %6 = vector.shape_cast %5 : vector<1x1x4x1xbf16> to vector<4x1xbf16>
    %7 = tpu.concatenate %4, %6 in 1 : vector<4x127xbf16>, vector<4x1xbf16> -> vector<4x128xbf16>
    %c1_i32 = arith.constant 1 : i32
    %8 = arith.subi %c1_i32, %0 : i32
    %c0_8 = arith.constant 0 : index
    %c0_9 = arith.constant 0 : index
    %c0_10 = arith.constant 0 : index
    %c0_11 = arith.constant 0 : index
    %9 = vector.load %arg2[%c0_8, %c0_9, %c0_10, %c0_11] : memref<1x1x24x128xbf16, #tpu.memory_space<vmem>>, vector<1x1x12x128xbf16>
    %10 = vector.shape_cast %9 : vector<1x1x12x128xbf16> to vector<12x128xbf16>
    %c0_12 = arith.constant 0 : index
    %c0_13 = arith.constant 0 : index
    %11 = vector.load %arg4[%c0_12, %c0_13] : memref<8x12xbf16, #tpu.memory_space<vmem>>, vector<8x12xbf16>
    %cst = arith.constant dense<0.000000e+00> : vector<8x128xf32>
    %12 = tpu.matmul %11, %10, %cst {dimension_numbers = #tpu.dot_dimension_numbers<[1], [0], [0], [1], [0, 0, 1, 1], [], []>} : vector<8x12xbf16>, vector<12x128xbf16>, vector<8x128xf32> -> vector<8x128xf32>
    %13 = vector.broadcast %1 : vector<8x1xf32> to vector<8x128xf32>
    %14 = arith.addf %12, %13 : vector<8x128xf32>
    %cst_14 = arith.constant 0.000000e+00 : f32
    %15 = vector.broadcast %cst_14 : f32 to vector<8x128xf32>
    %16 = arith.maximumf %14, %15 : vector<8x128xf32>
    %c4_i32 = arith.constant 4 : i32
    %17 = arith.subi %c4_i32, %0 : i32
    %18 = vector.broadcast %8 : i32 to vector<1x128xi32>
    %19 = arith.cmpi sge, %2, %18 : vector<1x128xi32>
    %20 = vector.broadcast %17 : i32 to vector<1x128xi32>
    %21 = arith.cmpi slt, %2, %20 : vector<1x128xi32>
    %22 = arith.andi %19, %21 : vector<1x128xi1>
    %cst_15 = arith.constant 0.000000e+00 : f32
    %23 = vector.shape_cast %22 : vector<1x128xi1> to vector<1x128xi1>
    %24 = vector.broadcast %23 : vector<1x128xi1> to vector<8x128xi1>
    %25 = vector.broadcast %cst_15 : f32 to vector<8x128xf32>
    %26 = arith.select %24, %16, %25 : vector<8x128xi1>, vector<8x128xf32>
    %27 = arith.truncf %26 : vector<8x128xf32> to vector<8x128xbf16>
    %c0_16 = arith.constant 0 : index
    %c0_17 = arith.constant 0 : index
    %c0_18 = arith.constant 0 : index
    %c0_19 = arith.constant 0 : index
    %c0_20 = arith.constant 0 : index
    %28 = vector.load %arg6[%c0_16, %c0_17, %c0_18, %c0_19, %c0_20] : memref<1x1x3x8x128xbf16, #tpu.memory_space<vmem>>, vector<1x1x1x8x128xbf16>
    %29 = vector.shape_cast %28 : vector<1x1x1x8x128xbf16> to vector<8x128xbf16>
    %30 = vector.shape_cast %27 : vector<8x128xbf16> to vector<1x1x1x8x128xbf16>
    tpu.vector_store %arg6[%c0_16, %c0_17, %c0_18, %c0_19, %c0_20], %30 {strides = array<i32>} : memref<1x1x3x8x128xbf16, #tpu.memory_space<vmem>>, vector<1x1x1x8x128xbf16>,
    %c0_21 = arith.constant 0 : index
    %c0_22 = arith.constant 0 : index
    %c8 = arith.constant 8 : index
    %c0_23 = arith.constant 0 : index
    %31 = vector.load %arg2[%c0_21, %c0_22, %c8, %c0_23] : memref<1x1x24x128xbf16, #tpu.memory_space<vmem>>, vector<1x1x12x128xbf16>
    %32 = vector.shape_cast %31 : vector<1x1x12x128xbf16> to vector<12x128xbf16>
    %c0_24 = arith.constant 0 : index
    %c0_25 = arith.constant 0 : index
    %33 = vector.load %arg4[%c0_24, %c0_25] : memref<8x12xbf16, #tpu.memory_space<vmem>>, vector<8x12xbf16>
    %cst_26 = arith.constant dense<0.000000e+00> : vector<8x128xf32>
    %34 = tpu.matmul %33, %32, %cst_26 {dimension_numbers = #tpu.dot_dimension_numbers<[1], [0], [0], [1], [0, 0, 1, 1], [], []>} : vector<8x12xbf16>, vector<12x128xbf16>, vector<8x128xf32> -> vector<8x128xf32>
    %35 = vector.broadcast %1 : vector<8x1xf32> to vector<8x128xf32>
    %36 = arith.addf %34, %35 : vector<8x128xf32>
    %cst_27 = arith.constant 0.000000e+00 : f32
    %37 = vector.broadcast %cst_27 : f32 to vector<8x128xf32>
    %38 = arith.maximumf %36, %37 : vector<8x128xf32>
    %c4_i32_28 = arith.constant 4 : i32
    %39 = arith.subi %c4_i32_28, %0 : i32
    %40 = vector.broadcast %8 : i32 to vector<1x128xi32>
    %41 = arith.cmpi sge, %2, %40 : vector<1x128xi32>
    %42 = vector.broadcast %39 : i32 to vector<1x128xi32>
    %43 = arith.cmpi slt, %2, %42 : vector<1x128xi32>
    %44 = arith.andi %41, %43 : vector<1x128xi1>
    %cst_29 = arith.constant 0.000000e+00 : f32
    %45 = vector.shape_cast %44 : vector<1x128xi1> to vector<1x128xi1>
    %46 = vector.broadcast %45 : vector<1x128xi1> to vector<8x128xi1>
    %47 = vector.broadcast %cst_29 : f32 to vector<8x128xf32>
    %48 = arith.select %46, %38, %47 : vector<8x128xi1>, vector<8x128xf32>
    %49 = arith.truncf %48 : vector<8x128xf32> to vector<8x128xbf16>
    %c0_30 = arith.constant 0 : index
    %c0_31 = arith.constant 0 : index
    %c1_32 = arith.constant 1 : index
    %c0_33 = arith.constant 0 : index
    %c0_34 = arith.constant 0 : index
    %50 = vector.load %arg6[%c0_30, %c0_31, %c1_32, %c0_33, %c0_34] : memref<1x1x3x8x128xbf16, #tpu.memory_space<vmem>>, vector<1x1x1x8x128xbf16>
    %51 = vector.shape_cast %50 : vector<1x1x1x8x128xbf16> to vector<8x128xbf16>
    %52 = vector.shape_cast %49 : vector<8x128xbf16> to vector<1x1x1x8x128xbf16>
    tpu.vector_store %arg6[%c0_30, %c0_31, %c1_32, %c0_33, %c0_34], %52 {strides = array<i32>} : memref<1x1x3x8x128xbf16, #tpu.memory_space<vmem>>, vector<1x1x1x8x128xbf16>,
    %c0_35 = arith.constant 0 : index
    %c0_36 = arith.constant 0 : index
    %c16 = arith.constant 16 : index
    %c0_37 = arith.constant 0 : index
    %53 = vector.load %arg2[%c0_35, %c0_36, %c16, %c0_37] : memref<1x1x24x128xbf16, #tpu.memory_space<vmem>>, vector<1x1x8x128xbf16>
    %54 = vector.shape_cast %53 : vector<1x1x8x128xbf16> to vector<8x128xbf16>
    %c0_38 = arith.constant 0 : index
    %c0_39 = arith.constant 0 : index
    %55 = vector.load %arg4[%c0_38, %c0_39] : memref<8x12xbf16, #tpu.memory_space<vmem>>, vector<8x8xbf16>
    %cst_40 = arith.constant dense<0.000000e+00> : vector<8x128xf32>
    %56 = tpu.matmul %55, %54, %cst_40 {dimension_numbers = #tpu.dot_dimension_numbers<[1], [0], [0], [1], [0, 0, 1, 1], [], []>} : vector<8x8xbf16>, vector<8x128xbf16>, vector<8x128xf32> -> vector<8x128xf32>
    %c0_41 = arith.constant 0 : index
    %c8_42 = arith.constant 8 : index
    %57 = vector.load %arg4[%c0_41, %c8_42] : memref<8x12xbf16, #tpu.memory_space<vmem>>, vector<8x4xbf16>
    %cst_43 = arith.constant dense<0.000000e+00> : vector<8x128xf32>
    %58 = tpu.matmul %57, %7, %cst_43 {dimension_numbers = #tpu.dot_dimension_numbers<[1], [0], [0], [1], [0, 0, 1, 1], [], []>} : vector<8x4xbf16>, vector<4x128xbf16>, vector<8x128xf32> -> vector<8x128xf32>
    %59 = arith.addf %56, %58 : vector<8x128xf32>
    %60 = vector.broadcast %1 : vector<8x1xf32> to vector<8x128xf32>
    %61 = arith.addf %59, %60 : vector<8x128xf32>
    %cst_44 = arith.constant 0.000000e+00 : f32
    %62 = vector.broadcast %cst_44 : f32 to vector<8x128xf32>
    %63 = arith.maximumf %61, %62 : vector<8x128xf32>
    %c3_i32 = arith.constant 3 : i32
    %64 = arith.subi %c3_i32, %0 : i32
    %65 = vector.broadcast %8 : i32 to vector<1x128xi32>
    %66 = arith.cmpi sge, %2, %65 : vector<1x128xi32>
    %67 = vector.broadcast %64 : i32 to vector<1x128xi32>
    %68 = arith.cmpi slt, %2, %67 : vector<1x128xi32>
    %69 = arith.andi %66, %68 : vector<1x128xi1>
    %cst_45 = arith.constant 0.000000e+00 : f32
    %70 = vector.shape_cast %69 : vector<1x128xi1> to vector<1x128xi1>
    %71 = vector.broadcast %70 : vector<1x128xi1> to vector<8x128xi1>
    %72 = vector.broadcast %cst_45 : f32 to vector<8x128xf32>
    %73 = arith.select %71, %63, %72 : vector<8x128xi1>, vector<8x128xf32>
    %74 = arith.truncf %73 : vector<8x128xf32> to vector<8x128xbf16>
    %c0_46 = arith.constant 0 : index
    %c0_47 = arith.constant 0 : index
    %c2 = arith.constant 2 : index
    %c0_48 = arith.constant 0 : index
    %c0_49 = arith.constant 0 : index
    %75 = vector.load %arg6[%c0_46, %c0_47, %c2, %c0_48, %c0_49] : memref<1x1x3x8x128xbf16, #tpu.memory_space<vmem>>, vector<1x1x1x8x128xbf16>
    %76 = vector.shape_cast %75 : vector<1x1x1x8x128xbf16> to vector<8x128xbf16>
    %77 = vector.shape_cast %74 : vector<8x128xbf16> to vector<1x1x1x8x128xbf16>
    tpu.vector_store %arg6[%c0_46, %c0_47, %c2, %c0_48, %c0_49], %77 {strides = array<i32>} : memref<1x1x3x8x128xbf16, #tpu.memory_space<vmem>>, vector<1x1x1x8x128xbf16>,
    return
  }
  func.func @transform_0(%arg0: i32, %arg1: i32) -> (i32, i32, i32, i32) {
    %c0_i32 = arith.constant 0 : i32
    %c0_i32_0 = arith.constant 0 : i32
    %c0_i32_1 = arith.constant 0 : i32
    return %arg0, %arg1, %c0_i32, %c0_i32_0 : i32, i32, i32, i32
  }
  func.func @transform_1(%arg0: i32, %arg1: i32) -> (i32, i32, i32, i32) {
    %c1_i32 = arith.constant 1 : i32
    %0 = arith.addi %arg1, %c1_i32 : i32
    %c0_i32 = arith.constant 0 : i32
    %c0_i32_0 = arith.constant 0 : i32
    %c0_i32_1 = arith.constant 0 : i32
    return %arg0, %0, %c0_i32, %c0_i32_0 : i32, i32, i32, i32
  }
  func.func @transform_2(%arg0: i32, %arg1: i32) -> (i32, i32) {
    %c0_i32 = arith.constant 0 : i32
    %c0_i32_0 = arith.constant 0 : i32
    %c0_i32_1 = arith.constant 0 : i32
    return %c0_i32, %c0_i32_0 : i32, i32
  }
  func.func @transform_3(%arg0: i32, %arg1: i32) -> (i32, i32) {
    %c0_i32 = arith.constant 0 : i32
    %c0_i32_0 = arith.constant 0 : i32
    %c0_i32_1 = arith.constant 0 : i32
    return %c0_i32, %c0_i32_0 : i32, i32
  }
  func.func @transform_4(%arg0: i32, %arg1: i32) -> (i32, i32, i32, i32, i32) {
    %c0_i32 = arith.constant 0 : i32
    %c0_i32_0 = arith.constant 0 : i32
    %c0_i32_1 = arith.constant 0 : i32
    %c0_i32_2 = arith.constant 0 : i32
    return %arg0, %arg1, %c0_i32, %c0_i32_0, %c0_i32_1 : i32, i32, i32, i32, i32
  }
}

</mosaic_0001>

<bundles_post_ra>
// kernel: leenet_conv_block2_forward.3
= control target key start
LH: loop header
LB: loop body
LE: loop exit
PB: predicated region body
PF: predicated region fallthrough
CT: control target
= control target key end

     0   :  { %s841_s15 = smov 0   ;;  %s843_s16 = smov 0   ;;  %s904_s0 = inlined_call_operand.vmem [shape: bf16[2,2,24,128], index: 0, kind: input, shape index: {}, may-alias: {0,1}]   ;;  %s905_s1 = inlined_call_operand.vmem [shape: bf16[2,2,24,128], index: 1, kind: input, shape index: {}, may-alias: {0,1}]   ;;  %s906_s2 = inlined_call_operand.vmem [shape: bf16[8,24], index: 2, kind: input, shape index: {}]   ;;  %s907_s3 = inlined_call_operand.vmem [shape: f32[8,1], index: 3, kind: input, shape index: {}]   ;;  %s908_s4 = inlined_call_operand.vmem [shape: f32[2,8,128], index: 4, kind: output, shape index: {}]  }
   0x1   :  { %s845_s17 = smov 0  }
   0x2 LB: > { %s26_s18 = sadd.s32 1, %s804_s16  ;;  %p684_p0 = scmp.ge.s32.totalorder %s808_s17, 1  ;;  %s808_s17 = sphi %s845_s17, %s14_s17   ;;  %s804_s16 = sphi %s843_s16, %s910_s16   ;;  %s800_s15 = sphi %s841_s15, %s909_s15  }
   0x3   : > { %p28_p1 = scmp.ge.s32.totalorder %s26_s18, 2  ;;  %p202_p2 = scmp.lt.s32.totalorder %s808_s17, 3 }
   0x5   : > { %s912_s18 = smov (%p28_p1, %s26_s18), 0  ;;  %p203_p3 = pnand %p684_p0, %p202_p2 }
   0x6   : > { %p244_p4 = scmp.lt.s32.totalorder (!%p203_p3), %s800_s15, 1  ;;  %s811_s21 = smov (!%p203_p3), 112  }
   0x7   : > { %206 = sbr.rel (%p203_p3) target bundleno = 360 (0x168), region = 36  ;;  %s813_s30 = smov (!%p203_p3), 127  }
   0x8   : > { %s814_s5 = smov (!%p203_p3), 120  }
   0xc   : > { %v862_v0 = vld [vmem:[%s906_s2] sm:$0xf]  ;;  %v810_v2 = vmov 0.0   ;;  %s914_s15 = smov (!%p244_p4, %s800_s15), 1  ;;  %vm812_vm0 = vmmov 0   ;;  %vm324_vm1 = vcmask 1043456   ;;  %v274_v35 = vlaneseq }
   0xd   : > { %v692_v1 = vcombine.low %v862_v0, %v862_v0  ;;  %720 = vmatprep.subr.bf16.mxu1 %v810_v2  ;;  %714 = vmatprep.subr.bf16.mxu0 %v810_v2  ;;  %s746_s22 = smul.u32 24, %s914_s15  ;;  %vm369_vm2 = vcmask 130048   ;;  %vm320_vm3 = vcmask 64512   ;;  %v273_v12 = vld [vmem:[%s907_s3] sm:$0xff]  ;;  %v815_v13 = vmov 0   ;;  %s687_s8 = sshll.u32 %s914_s15, 3 }
   0xe   : > { %722 = vmatprep.mubr.msk.bf16.mxu1 %vm812_vm0, %v810_v2  ;;  %716 = vmatprep.mubr.msk.bf16.mxu0 %vm812_vm0, %v810_v2  ;;  %vm306_vm4 = vcmask 1039360   ;;  %vm530_vm5 = vcmask 195584   ;;  %v275_v40 = vand.u32 127, %v274_v35  ;;  %s270_s11 = scalar_lea.vmem %s908_s4, %s687_s8 }
   0xf   : > { %318 = vrot.lane.b32.xlu1 %v692_v1, %s811_s21  ;;  %s252_s25 = scalar_lea.vmem %s904_s0, %s746_s22  ;;  %s702_s26 = sadd.s32 12, %s746_s22  ;;  %779 = vset.pattern.permute.xlu0 %v815_v13 }
  0x10   : > { %v276_v3 = vld [vmem:[%s252_s25] sm:$0xf]  ;;  %v277_v4 = vld [vmem:[%s252_s25 + $0x4] sm:$0xf]  ;;  %s262_s29 = scalar_lea.vmem %s905_s1, %s702_s26  ;;  %v278_v5 = vld [vmem:[%s252_s25 + $0x8] sm:$0xf] }
  0x11   : > { %v688_v6 = vcombine.low %v276_v3, %v277_v4  ;;  %v689_v7 = vcombine.low %v278_v5, %v278_v5  ;;  %v694_v8 = vcombine.low %v277_v4, %v278_v5  ;;  %v781_v9 = vld [vmem:[%s262_s29] sm:$0xff]   ;;  %v478_v10 = vsel %vm324_vm1, %v278_v5, 0  ;;  %v784_v11 = vld [vmem:[%s262_s29 + $0x8] ss:$0 sps:$4 sm:$0xff]  }
  0x12   : > { %vm423_vm6 = vcmp.ge.s32.totalorder %v275_v40, 1  ;;  %vm425_vm7 = vcmp.lt.s32.totalorder %v275_v40, 3 }
  0x13   : > { %290 = vrot.lane.b32.xlu0 %v688_v6, %s813_s30  ;;  %292 = vrot.lane.b32.xlu1 %v689_v7, %s813_s30  ;;  %vm426_vm8 = vmand %vm423_vm6, %vm425_vm7 }
  0x14   : > { %721 = vmatpush3.bf16.msra.mxu1 %v694_v8 }
  0x15   : > { %732 = vmatprep.subr.bf16.mxu1 %v810_v2 }
  0x17   : > { %302 = vrot.lane.b32.xlu0 %v781_v9, %s813_s30  ;;  %430 = vrot.lane.b32.xlu1 %v692_v1, %s814_s5 }
  0x18   : > { %723 = vmatmul.mubr.msk.bf16.vlgmr.msra.gmra.mxu1 %vm369_vm2, %v862_v0 }
  0x19   : > { %733 = vmatpush3.bf16.msra.mxu1 %v478_v10  ;;  %734 = vmatprep.mubr.msk.bf16.mxu1 %vm812_vm0, %v810_v2 }
  0x1b   : > { %304 = vrot.lane.b32.xlu0 %v784_v11, %s813_s30 }
  0x1f   : > { %415 = vperm.xlu0 %779, %v273_v12  }
  0x20   : > { %735 = vmatmul.mubr.msk.bf16.vlgmr.msra.gmra.mxu1 %vm320_vm3, %v862_v0 }
  0x81   : > { %v319_v15 = vpop.permute.xlu1 %318 }
  0x85   : > { %v291_v14 = vpop.permute.xlu0 %290  ;;  %v293_v19 = vpop.permute.xlu1 %292 }
  0x89   : > { %v303_v16 = vpop.permute.xlu0 %302  ;;  %v431_v22 = vpop.permute.xlu1 %430 }
  0x8a   : > { %v309_v17 = vsel %vm306_vm4, %v291_v14, %v303_v16 }
  0x8b   : > { %v325_v18 = vsel %vm324_vm1, %v309_v17, 0 }
  0x8c   : > { %715 = vmatpush3.bf16.msra.mxu0 %v325_v18 }
  0x8d   : > { %726 = vmatprep.subr.bf16.mxu0 %v810_v2  ;;  %v305_v20 = vpop.permute.xlu0 %304 }
  0x8e   : > { %v313_v21 = vsel %vm306_vm4, %v293_v19, %v305_v20 }
  0x8f   : > { %717 = vmatmul.mubr.msk.bf16.vlgmr.msra.gmra.mxu0 %vm320_vm3, %v319_v15  ;;  %v533_v23 = vsel %vm324_vm1, %v313_v21, 0 }
  0x90   : > { %727 = vmatpush3.bf16.msra.mxu0 %v309_v17  ;;  %728 = vmatprep.mubr.msk.bf16.mxu0 %vm812_vm0, %v810_v2 }
  0x91   : > { %738 = vmatprep.subr.bf16.mxu0 %v810_v2 }
  0x97   : > { %729 = vmatmul.mubr.msk.bf16.vlgmr.msra.gmra.mxu0 %vm369_vm2, %v431_v22 }
  0x98   : > { %739 = vmatpush3.bf16.msra.mxu0 %v533_v23  ;;  %742 = vmatprep.mubr.msk.bf16.mxu0 %vm812_vm0, %v810_v2 }
  0x99   : > { %740 = vmatprep.subr.bf16.mxu0 %v810_v2 }
  0x9a   : > { %v416_v38 = vpop.permute.xlu0 %415 }
  0x9c   : > { %741 = vmatpush3.bf16.msra.mxu0 %v309_v17 }
  0x9f   : > { %743 = vmatmul.mubr.msk.bf16.vlgmr.msra.gmra.mxu0 %vm530_vm5, %v862_v0 }
  0xd8   : > { %v407_v24 = vpop.f32.mrf.mxu1 }
  0xda   : > { %v724_v25 = vpop.f32.mrf.mxu1 }
  0xdc   : > { %v410_v26 = vpop.f32.mrf.mxu1 }
  0xde   : > { %v725_v27 = vpop.f32.mrf.mxu1 }
  0xe0   : > { %v514_v28 = vpop.f32.mrf.mxu1 }
  0xe2   : > { %v736_v29 = vpop.f32.mrf.mxu1 }
  0xe4   : > { %v517_v30 = vpop.f32.mrf.mxu1 }
  0xe6   : > { %v737_v31 = vpop.f32.mrf.mxu1 }
 0x14f   : > { %v361_v32 = vpop.f32.mrf.mxu0 }
 0x150   : > { %v408_v37 = vadd.f32 %v407_v24, %v361_v32 }
 0x151   : > { %v718_v33 = vpop.f32.mrf.mxu0 }
 0x152   : > { %v418_v43 = vadd.f32 %v416_v38, %v408_v37 }
 0x153   : > { %v364_v34 = vpop.f32.mrf.mxu0 }
 0x154   : > { %v419_v48 = vmax.f32 %v418_v43, 0.0 }
 0x155   : > { %v719_v36 = vpop.f32.mrf.mxu0 }
 0x156   : > { %v429_v53 = vsel %vm426_vm8, %v419_v48, 0.0 }
 0x157   : > { %v469_v39 = vpop.f32.mrf.mxu0 }
 0x158   : > { %v515_v41 = vadd.f32 %v514_v28, %v469_v39 }
 0x159   : > { %v730_v42 = vpop.f32.mrf.mxu0 }
 0x15a   : > { %v520_v44 = vadd.f32 %v515_v41, %v416_v38 }
 0x15b   : > { %v472_v45 = vpop.f32.mrf.mxu0 }
 0x15c   : > { %v521_v46 = vmax.f32 %v520_v44, 0.0 }
 0x15d   : > { %v731_v47 = vpop.f32.mrf.mxu0 }
 0x15e   : > { %v528_v50 = vsel %vm425_vm7, %v521_v46, 0.0 }
 0x15f   : > { %v569_v49 = vpop.f32.mrf.mxu0  ;;  %v529_v55 = vmax.f32 %v429_v53, %v528_v50 }
 0x160   : > { %v570_v51 = vadd.f32 %v569_v49, %v416_v38 }
 0x161   : > { %v744_v52 = vpop.f32.mrf.mxu0 }
 0x162   : > { %v575_v54 = vmax.f32 %v570_v51, 0.0 }
 0x163   : > { %v572_v56 = vpop.f32.mrf.mxu0 }
 0x164   : > { %v576_v57 = vsel %vm425_vm7, %v575_v54, 0.0 }
 0x165   : > { %v577_v58 = vmax.f32 %v529_v55, %v576_v57  ;;  %v745_v59 = vpop.f32.mrf.mxu0 }
 0x167   : > { %578 = vst [vmem:[%s270_s11] sm:$0xff] %v577_v58 }
 0x168 PF: > { %s14_s17 = sadd.s32 1, %s808_s17   ;;  %s909_s15 = smov %s804_s16 }
 0x169   : > { %p11_p5 = scmp.ge.s32.totalorder %s14_s17, 4   ;;  %s910_s16 = smov %s912_s18 }
 0x16b   :  { %13 = sbr.rel (!%p11_p5) target bundleno = 2 (0x2), region = 69 }

// kernel: leenet_conv_block2_forward.2
= control target key start
LH: loop header
LB: loop body
LE: loop exit
PB: predicated region body
PF: predicated region fallthrough
CT: control target
= control target key end

     0   :  { %s840_s15 = smov 0   ;;  %s842_s16 = smov 0   ;;  %s929_s0 = inlined_call_operand.vmem [shape: bf16[2,3,24,128], index: 0, kind: input, shape index: {}, may-alias: {0,1}]   ;;  %s930_s1 = inlined_call_operand.vmem [shape: bf16[2,3,24,128], index: 1, kind: input, shape index: {}, may-alias: {0,1}]   ;;  %s931_s2 = inlined_call_operand.vmem [shape: bf16[8,12], index: 2, kind: input, shape index: {}]   ;;  %s932_s3 = inlined_call_operand.vmem [shape: f32[8,1], index: 3, kind: input, shape index: {}]   ;;  %s933_s4 = inlined_call_operand.vmem [shape: bf16[2,2,3,8,128], index: 4, kind: output, shape index: {}]  }
   0x1   :  { %s844_s17 = smov 0   ;;  %s846_s18 = smov 0  }
   0x2   :  { %s848_s19 = smov 0  }
   0x3 LB: > { %s23_s20 = sadd.s32 1, %s800_s17  ;;  %s26_s21 = sadd.s32 1, %s804_s18  ;;  %s808_s19 = sphi %s848_s19, %s14_s19   ;;  %s804_s18 = sphi %s846_s18, %s937_s18   ;;  %s800_s17 = sphi %s844_s17, %s936_s17   ;;  %s796_s16 = sphi %s842_s16, %s935_s16   ;;  %s792_s15 = sphi %s840_s15, %s934_s15  }
   0x4   : > { %p24_p0 = scmp.ge.s32.totalorder %s23_s20, 2  ;;  %p663_p1 = scmp.ge.s32.totalorder %s808_s19, 1 }
   0x5   : > { %p202_p2 = scmp.lt.s32.totalorder %s808_s19, 5 }
   0x6   : > { %s939_s20 = smov (%p24_p0, %s23_s20), 0  ;;  %s941_s21 = smov (!%p24_p0, %s26_s21), %s804_s18 }
   0x7   : > { %p203_p3 = pnand %p663_p1, %p202_p2  ;;  %p28_p4 = scmp.ge.s32.totalorder %s941_s21, 2 }
   0x8   : > { %p246_p5 = scmp.lt.s32.totalorder (!%p203_p3), %s796_s16, 1  ;;  %p248_p6 = scmp.lt.s32.totalorder (!%p203_p3), %s792_s15, 2 }
   0x9   : > { %s943_s21 = smov (%p28_p4, %s941_s21), 0  ;;  %206 = sbr.rel (%p203_p3) target bundleno = 350 (0x15e), region = 36 }
   0xa   : > { %s255_s24 = sadd.s32 (!%p203_p3), 1, %s792_s15  ;;  %s812_s28 = smov (!%p203_p3), 120  }
   0xb   : > { %p258_p7 = scmp.lt.s32.totalorder (!%p203_p3), %s255_s24, 2  ;;  %s814_s13 = smov (!%p203_p3), 127  }
   0xc   : > { %p268_p8 = scmp.lt.s32.totalorder (!%p203_p3), %s792_s15, 1 }
   0xe   : > { %v430_v0 = vld [vmem:[%s931_s2] sm:$0xf]  ;;  %v810_v1 = vmov 0.0   ;;  %s945_s16 = smov (!%p246_p5, %s796_s16), 1  ;;  %vm811_vm0 = vmmov 0   ;;  %s947_s24 = smov (!%p258_p7, %s255_s24), 2  ;;  %v278_v20 = vlaneseq }
   0xf   : > { %689 = vmatprep.subr.bf16.mxu0 %v810_v1  ;;  %695 = vmatprep.subr.bf16.mxu1 %v810_v1  ;;  %v675_v2 = vcombine.low %v430_v0, %v430_v0  ;;  %s249_s25 = scalar_select %p248_p6, %s792_s15, 2  ;;  %v277_v3 = vld [vmem:[%s932_s3] sm:$0xff]  ;;  %v813_v4 = vmov 0   ;;  %vm314_vm1 = vcmask 1045504   ;;  %vm310_vm2 = vcmask 97280  }
  0x10   : > { %691 = vmatprep.mubr.msk.bf16.mxu0 %vm811_vm0, %v810_v1  ;;  %697 = vmatprep.mubr.msk.bf16.mxu1 %vm811_vm0, %v810_v1  ;;  %s714_s26 = smul.u32 9, %s945_s16  ;;  %v299_v10 = vld [vmem:[%s931_s2] sm:$0xf]  ;;  %vm487_vm3 = vcmask 1043456   ;;  %vm483_vm4 = vcmask 64512   ;;  %vm292_vm5 = vcmask 1039360  }
  0x11   : > { %s713_s27 = smul.u32 3, %s249_s25  ;;  %434 = vrot.lane.b32.xlu1 %v675_v2, %s812_s28  ;;  %764 = vset.pattern.permute.xlu0 %v813_v4  ;;  %v372_v13 = vld [vmem:[%s931_s2] sm:$0xf]  ;;  %vm440_vm6 = vcmask 1041408   ;;  %vm436_vm7 = vcmask 31744   ;;  %s902_s28 = sshll.u32 %s792_s15, 7 }
  0x12   : > { %s715_s5 = smul.u32 3, %s947_s24  ;;  %763 = vset.pattern.permute.xlu1 %v813_v4  ;;  %s949_s15 = smov (!%p268_p8, %s792_s15), 1  ;;  %v279_v21 = vand.u32 127, %v278_v20 }
  0x13   : > { %s252_s29 = sadd.s32 %s714_s26, %s713_s27  ;;  %s716_s6 = smul.u32 3, %s949_s15 }
  0x14   : > { %s664_s30 = sshll.u32 %s252_s29, 2  ;;  %s262_s11 = sadd.s32 %s715_s5, %s714_s26 }
  0x15   : > { %s254_s10 = scalar_lea.vmem %s929_s0, %s664_s30  ;;  %302 = vperm.xlu1 %763, %v277_v3   ;;  %s665_s12 = sshll.u32 %s262_s11, 2 }
  0x16   : > { %v765_v5 = vld [vmem:[%s254_s10] ss:$0 sps:$4 sm:$0x33]   ;;  %s264_s23 = scalar_lea.vmem %s930_s1, %s665_s12  ;;  %v769_v9 = vld [vmem:[%s254_s10 + $0x4] sm:$0x3f]   ;;  %s296_s29 = ssub.s32 1, %s902_s28 }
  0x17   : > { %285 = vrot.lane.b32.xlu0 %v765_v5, %s814_s13  ;;  %v768_v6 = vld [vmem:[%s254_s10] sm:$0x3f]   ;;  %v429_v11 = vld [vmem:[%s254_s10 + $0x8] sm:$0xf]  ;;  %v382_v12 = vsel %vm314_vm1, %v769_v9, 0  ;;  %s359_s30 = ssub.s32 4, %s902_s28  ;;  %v360_v22 = vstv %s296_s29 }
  0x18   : > { %v766_v7 = vld [vmem:[%s264_s23] ss:$0 sps:$4 sm:$0x33]   ;;  %v316_v8 = vsel %vm314_vm1, %v768_v6, 0  ;;  %696 = vmatpush3.bf16.msra.mxu1 %v382_v12  ;;  %v489_v14 = vsel %vm487_vm3, %v429_v11, 0  ;;  %s717_s5 = smul.u32 6, %s945_s16  ;;  %v362_v23 = vstv %s359_s30  ;;  %vm361_vm8 = vcmp.ge.s32.totalorder %v279_v21, %v360_v22 }
  0x19   : > { %690 = vmatpush3.bf16.msra.mxu0 %v316_v8  ;;  %707 = vmatprep.subr.bf16.mxu1 %v810_v1  ;;  %vm363_vm9 = vcmp.lt.s32.totalorder %v279_v21, %v362_v23  ;;  %s533_s10 = ssub.s32 3, %s902_s28 }
  0x1a   : > { %701 = vmatprep.subr.bf16.mxu0 %v810_v1  ;;  %s272_s7 = sadd.s32 %s717_s5, %s716_s6  ;;  %vm364_vm10 = vmand %vm361_vm8, %vm363_vm9  ;;  %v534_v45 = vstv %s533_s10 }
  0x1b   : > { %290 = vrot.lane.b32.xlu0 %v766_v7, %s814_s13  ;;  %698 = vmatmul.mubr.msk.bf16.vlgmr.msra.gmra.mxu1 %vm310_vm2, %v372_v13  ;;  %s666_s8 = sshll.u32 %s272_s7, 2  ;;  %vm535_vm11 = vcmp.lt.s32.totalorder %v279_v21, %v534_v45 }
  0x1c   : > { %692 = vmatmul.mubr.msk.bf16.vlgmr.msra.gmra.mxu0 %vm310_vm2, %v299_v10  ;;  %708 = vmatpush3.bf16.msra.mxu1 %v489_v14  ;;  %s274_s15 = scalar_lea.vmem %s933_s4, %s666_s8  ;;  %vm536_vm12 = vmand %vm361_vm8, %vm535_vm11 }
  0x1d   : > { %703 = vmatprep.mubr.msk.bf16.mxu0 %vm811_vm0, %v810_v1  ;;  %709 = vmatprep.mubr.msk.bf16.mxu1 %vm811_vm0, %v810_v1 }
  0x23   : > { %710 = vmatmul.mubr.msk.bf16.vlgmr.msra.gmra.mxu1 %vm483_vm4, %v430_v0 }
  0x83   : > { %v435_v19 = vpop.permute.xlu1 %434 }
  0x89   : > { %v286_v15 = vpop.permute.xlu0 %285 }
  0x8d   : > { %v291_v16 = vpop.permute.xlu0 %290 }
  0x8e   : > { %v295_v17 = vsel %vm292_vm5, %v286_v15, %v291_v16 }
  0x8f   : > { %v441_v18 = vsel %vm440_vm6, %v295_v17, 0 }
  0x90   : > { %702 = vmatpush3.bf16.msra.mxu0 %v441_v18  ;;  %v303_v24 = vpop.permute.xlu1 %302 }
  0x93   : > { %704 = vmatmul.mubr.msk.bf16.vlgmr.msra.gmra.mxu0 %vm436_vm7, %v435_v19 }
  0xdb   : > { %v418_v27 = vpop.f32.mrf.mxu1 }
  0xdc   : > { %v352_v25 = vpop.f32.mrf.mxu0  ;;  %v419_v30 = vadd.f32 %v418_v27, %v303_v24 }
  0xdd   : > { %v353_v26 = vadd.f32 %v352_v25, %v303_v24  ;;  %v699_v31 = vpop.f32.mrf.mxu1 }
  0xde   : > { %v693_v28 = vpop.f32.mrf.mxu0  ;;  %v424_v34 = vmax.f32 %v419_v30, 0.0 }
  0xdf   : > { %v358_v29 = vmax.f32 %v353_v26, 0.0  ;;  %v421_v35 = vpop.f32.mrf.mxu1 }
  0xe0   : > { %v355_v32 = vpop.f32.mrf.mxu0  ;;  %v425_v38 = vsel %vm364_vm10, %v424_v34, 0.0 }
  0xe1   : > { %v367_v33 = vsel %vm364_vm10, %v358_v29, 0.0  ;;  %v426_v39 = vpack.c.bf16 %v425_v38, %v425_v38  ;;  %v700_v40 = vpop.f32.mrf.mxu1 }
  0xe2   : > { %v368_v36 = vpack.c.bf16 %v367_v33, %v367_v33  ;;  %v694_v37 = vpop.f32.mrf.mxu0 }
  0xe3   : > { %674 = vst [vmem:[%s274_s15 + $0x4] sm:$0xf] %v426_v39  ;;  %v525_v41 = vpop.f32.mrf.mxu1 }
  0xe4   : > { %369 = vst [vmem:[%s274_s15] sm:$0xf] %v368_v36 }
  0xe5   : > { %v711_v42 = vpop.f32.mrf.mxu1 }
  0xe7   : > { %v528_v43 = vpop.f32.mrf.mxu1 }
  0xe9   : > { %v712_v44 = vpop.f32.mrf.mxu1 }
 0x153   : > { %v477_v46 = vpop.f32.mrf.mxu0 }
 0x154   : > { %v526_v47 = vadd.f32 %v525_v41, %v477_v46 }
 0x155   : > { %v705_v48 = vpop.f32.mrf.mxu0 }
 0x156   : > { %v531_v49 = vadd.f32 %v526_v47, %v303_v24 }
 0x157   : > { %v480_v50 = vpop.f32.mrf.mxu0 }
 0x158   : > { %v532_v51 = vmax.f32 %v531_v49, 0.0 }
 0x159   : > { %v706_v52 = vpop.f32.mrf.mxu0 }
 0x15a   : > { %v539_v53 = vsel %vm536_vm12, %v532_v51, 0.0 }
 0x15b   : > { %v540_v54 = vpack.c.bf16 %v539_v53, %v539_v53 }
 0x15d   : > { %678 = vst [vmem:[%s274_s15 + $0x8] sm:$0xf] %v540_v54 }
 0x15e PF: > { %s14_s19 = sadd.s32 1, %s808_s19   ;;  %s934_s15 = smov %s800_s17 }
 0x15f   : > { %p11_p9 = scmp.ge.s32.totalorder %s14_s19, 6   ;;  %s935_s16 = smov %s804_s18 }
 0x160   : > { %s936_s17 = smov %s939_s20  ;;  %s937_s18 = smov %s943_s21 }
 0x161   :  { %13 = sbr.rel (!%p11_p9) target bundleno = 3 (0x3), region = 71 }

</bundles_post_ra>
